<compile_context>
chip_gen: v6e
topology: v6e:2x2x1
jax: 0.10.0
libtpu: 0.0.40
codegen_flags: <defaults>
</compile_context>

<pallas_src>
import jax
import jax.numpy as jnp
from jax.experimental import pallas as pl
from jax.experimental.pallas import tpu as pltpu

_BN_EPS = 1e-5
_WN_EPS = 1e-6
_LANE = 128
_SUBLANE = 8


def _round_up(x, m):
    return (x + m - 1) // m * m


def _softplus_f32(x):
    # Numerically stable softplus in f32 (VPU + EUP).
    return jnp.maximum(x, 0.0) + jnp.log(1.0 + jnp.exp(-jnp.abs(x)))


def _wn_generator_kernel(x_ref, w1_ref, t1_ref, w2_ref, t2_ref,
                         w3_ref, b3_ref, out_ref):
    # Linear1 (BN1 scale pre-folded into w1) + BN1 shift -> Softplus.
    h = jnp.dot(x_ref[...], w1_ref[...], preferred_element_type=jnp.float32)
    h = _softplus_f32(h + t1_ref[...])

    # Linear2 (BN2 scale pre-folded into w2) + BN2 shift -> Softplus.
    h = jnp.dot(h.astype(jnp.bfloat16), w2_ref[...],
                preferred_element_type=jnp.float32)
    h = _softplus_f32(h + t2_ref[...])

    # WN_Linear (weight pre-normalised) + bias -> Sigmoid (tanh form: 1 EUP op).
    y = jnp.dot(h.astype(jnp.bfloat16), w3_ref[...],
                preferred_element_type=jnp.float32)
    y = y + b3_ref[...]
    out_ref[...] = (0.5 * jnp.tanh(0.5 * y) + 0.5).astype(out_ref.dtype)


def init_params(noise_size, image_size, key=jax.random.PRNGKey(42)):
    """Deterministic synthetic parameters in PyTorch layout (f32)."""
    out_size = image_size * image_size
    ks = jax.random.split(key, 16)

    def vec(k, n, lo=None, hi=None, scale=0.1, base=0.0):
        if lo is not None:
            return jax.random.uniform(k, (n,), jnp.float32, lo, hi)
        return base + scale * jax.random.normal(k, (n,), jnp.float32)

    raw = dict(
        # Linear(noise_size, 500, bias=False)
        w1=0.05 * jax.random.normal(ks[0], (500, noise_size), jnp.float32),
        g1=vec(ks[1], 500, base=1.0, scale=0.1),
        be1=vec(ks[2], 500, scale=0.1),
        rm1=vec(ks[3], 500, scale=0.1),
        rv1=vec(ks[4], 500, lo=0.5, hi=1.5),
        # Linear(500, 500, bias=False)
        w2=0.05 * jax.random.normal(ks[5], (500, 500), jnp.float32),
        g2=vec(ks[6], 500, base=1.0, scale=0.1),
        be2=vec(ks[7], 500, scale=0.1),
        rm2=vec(ks[8], 500, scale=0.1),
        rv2=vec(ks[9], 500, lo=0.5, hi=1.5),
        # WN_Linear(500, out_size): weight ~ N(0, 0.1), scale ~1, small bias
        w3=0.1 * jax.random.normal(ks[10], (out_size, 500), jnp.float32),
        ws3=vec(ks[11], out_size, base=1.0, scale=0.05),
        b3=vec(ks[12], out_size, scale=0.05),
    )
    return raw


def prepare_params(raw, noise_size):
    """Fold BN (scale into weights) + WN into the weights once, pad to lane
    multiples, cast matmul operands to bf16."""
    n_out = raw["w3"].shape[0]
    k1p = _round_up(max(noise_size, 1), _LANE)
    hp = _round_up(500, _LANE)          # 512
    np_ = _round_up(n_out, _LANE)

    def pad2(a, rows, cols):
        return jnp.pad(a, ((0, rows - a.shape[0]), (0, cols - a.shape[1])))

    # BatchNorm (eval mode) folded to per-feature scale/shift; the scale is
    # folded into the weight columns so the kernel only applies the shift.
    s1 = raw["g1"] / jnp.sqrt(raw["rv1"] + _BN_EPS)
    t1 = raw["be1"] - raw["rm1"] * s1
    s2 = raw["g2"] / jnp.sqrt(raw["rv2"] + _BN_EPS)
    t2 = raw["be2"] - raw["rm2"] * s2

    # WN_Linear weight normalisation (row-wise L2 norm, per output feature).
    row_norm = jnp.sqrt(jnp.sum(raw["w3"] ** 2, axis=1, keepdims=True) + _WN_EPS)
    nw3 = raw["w3"] * (raw["ws3"][:, None] / row_norm)

    return dict(
        w1=pad2(raw["w1"].T * s1[None, :], k1p, hp).astype(jnp.bfloat16),
        w2=pad2(raw["w2"].T * s2[None, :], hp, hp).astype(jnp.bfloat16),
        w3=pad2(nw3.T, hp, np_).astype(jnp.bfloat16),
        t1=pad2(t1[None, :], 1, hp),
        t2=pad2(t2[None, :], 1, hp),
        b3=pad2(raw["b3"][None, :], 1, np_),
        in_features=int(noise_size),
        out_features=int(n_out),
    )


def wn_generator_forward(noise, kp, *, tile_b=256, tile_n=2048):
    """noise: [B, noise_size] f32  ->  [B, image_size**2] bf16 in (0, 1)."""
    B, K = noise.shape
    assert K == kp["in_features"]
    k1p, hp = kp["w1"].shape
    np_ = kp["w3"].shape[1]
    n_out = kp["out_features"]

    # Batch tile: no wrapper-side row padding (Pallas masks the ragged final
    # block).  For large batches keep >= 2 grid steps, 128-aligned, so the
    # "parallel" axis can be sharded across 2 TensorCores (v7x).
    if B <= _LANE:
        tb = _round_up(B, _SUBLANE)
    else:
        tb = min(_round_up(tile_b, _LANE), _round_up(pl.cdiv(B, 2), _LANE))
    grid_b = pl.cdiv(B, tb)

    # Output-column tile: bounds the WN weight block in VMEM at large
    # image_size and adds parallel grid steps.
    tn = min(np_, _round_up(tile_n, _LANE))
    grid_n = pl.cdiv(np_, tn)

    # Only the feature dim of x is zero-padded (fuses with the bf16 cast).
    x = jnp.pad(noise.astype(jnp.bfloat16), ((0, 0), (0, k1p - K)))

    def resident(shape):
        # Constant-index blocks stay VMEM-resident across the whole grid.
        return pl.BlockSpec(shape, lambda i, j: (0, 0))

    rows = grid_b * tb
    flops = 2 * rows * (grid_n * (k1p * hp + hp * hp) + hp * np_)
    transcendentals = rows * (grid_n * 4 * hp + np_)
    bytes_accessed = (
        rows * k1p * 2                                    # x (bf16)
        + (kp["w1"].size + kp["w2"].size) * 2             # resident weights
        + grid_b * kp["w3"].size * 2                      # streamed WN weight
        + (kp["t1"].size + kp["t2"].size + kp["b3"].size) * 4
        + rows * np_ * 2)                                 # output (bf16)

    # VMEM budget from the actual footprint (double-buffered tiles + resident
    # weights + f32 intermediates), with headroom.
    vmem_bytes = (2 * (tb * k1p * 2 + tb * tn * 2 + hp * tn * 2 + tn * 4)
                  + 2 * (k1p * hp * 2 + hp * hp * 2 + 2 * hp * 4)
                  + 6 * tb * hp * 4)
    vmem_limit = int(min(100 * 1024 * 1024,
                         max(32 * 1024 * 1024, vmem_bytes)))

    out = pl.pallas_call(
        _wn_generator_kernel,
        out_shape=jax.ShapeDtypeStruct((B, np_), jnp.bfloat16),
        grid=(grid_b, grid_n),
        in_specs=[
            pl.BlockSpec((tb, k1p), lambda i, j: (i, 0)),   # noise tile (pipelined)
            resident((k1p, hp)),                            # w1 (BN1 scale folded)
            resident((1, hp)),                              # BN1 shift
            resident((hp, hp)),                             # w2 (BN2 scale folded)
            resident((1, hp)),                              # BN2 shift
            pl.BlockSpec((hp, tn), lambda i, j: (0, j)),    # WN weight column tile
            pl.BlockSpec((1, tn), lambda i, j: (0, j)),     # WN bias column tile
        ],
        out_specs=pl.BlockSpec((tb, tn), lambda i, j: (i, j)),
        compiler_params=pltpu.CompilerParams(
            dimension_semantics=("parallel", "parallel"),
            vmem_limit_bytes=vmem_limit),
        cost_estimate=pl.CostEstimate(
            flops=int(flops),
            transcendentals=int(transcendentals),
            bytes_accessed=int(bytes_accessed)),
    )(x, kp["w1"], kp["t1"], kp["w2"], kp["t2"], kp["w3"], kp["b3"])

    # Column slice is a no-op when image_size**2 is already a lane multiple.
    return out[:, :n_out]


def reference_forward(noise, raw):
    """Pure-JAX f32 reference of WN_Generator.forward (eval-mode BN)."""
    x = noise @ raw["w1"].T
    x = (x - raw["rm1"]) / jnp.sqrt(raw["rv1"] + _BN_EPS) * raw["g1"] + raw["be1"]
    x = jax.nn.softplus(x)
    x = x @ raw["w2"].T
    x = (x - raw["rm2"]) / jnp.sqrt(raw["rv2"] + _BN_EPS) * raw["g2"] + raw["be2"]
    x = jax.nn.softplus(x)
    row_norm = jnp.sqrt(jnp.sum(raw["w3"] ** 2, axis=1, keepdims=True) + _WN_EPS)
    nw3 = raw["w3"] * (raw["ws3"][:, None] / row_norm)
    x = x @ nw3.T + raw["b3"]
    return jax.nn.sigmoid(x)


if __name__ == "__main__":
    key = jax.random.PRNGKey(0)
    k_noise, k_params = jax.random.split(key)

    B, noise_size, image_size = 4, 32, 16   # small shapes; output = 16*16 = 256
    noise = jax.random.normal(k_noise, (B, noise_size), dtype=jnp.float32)

    raw = init_params(noise_size, image_size, key=k_params)
    kp = prepare_params(raw, noise_size)

    out = jax.block_until_ready(wn_generator_forward(noise, kp))
    assert out.shape == (B, image_size * image_size), out.shape

    ref = reference_forward(noise, raw)
    max_err = float(jnp.max(jnp.abs(out.astype(jnp.float32) - ref)))
    assert max_err < 3e-2, f"max abs error vs reference: {max_err}"

    print("KERNEL_OK")
</pallas_src>

<mosaic_0001>
module attributes {stable_mosaic.version = 11 : i64} {
  func.func @_wn_generator_kernel(%arg0: i32, %arg1: i32, %arg2: memref<8x128xbf16, #tpu.memory_space<vmem>>, %arg3: memref<128x512xbf16, #tpu.memory_space<vmem>>, %arg4: memref<1x512xf32, #tpu.memory_space<vmem>>, %arg5: memref<512x512xbf16, #tpu.memory_space<vmem>>, %arg6: memref<1x512xf32, #tpu.memory_space<vmem>>, %arg7: memref<512x256xbf16, #tpu.memory_space<vmem>>, %arg8: memref<1x256xf32, #tpu.memory_space<vmem>>, %arg9: memref<8x256xbf16, #tpu.memory_space<vmem>>) attributes {dimension_semantics = [#tpu.dimension_semantics<parallel>, #tpu.dimension_semantics<parallel>], iteration_bounds = array<i64: 1, 1>, scalar_prefetch = 0 : i64, scratch_operands = 0 : i64, tpu.core_type = #tpu.core_type<tc>, window_params = [{transform_indices = @transform_0, window_bounds = array<i64: 8, 128>}, {pipeline_mode = #tpu.pipeline_mode<synchronous>, transform_indices = @transform_1, window_bounds = array<i64: 128, 512>}, {pipeline_mode = #tpu.pipeline_mode<synchronous>, transform_indices = @transform_2, window_bounds = array<i64: 1, 512>}, {pipeline_mode = #tpu.pipeline_mode<synchronous>, transform_indices = @transform_3, window_bounds = array<i64: 512, 512>}, {pipeline_mode = #tpu.pipeline_mode<synchronous>, transform_indices = @transform_4, window_bounds = array<i64: 1, 512>}, {transform_indices = @transform_5, window_bounds = array<i64: 512, 256>}, {transform_indices = @transform_6, window_bounds = array<i64: 1, 256>}, {transform_indices = @transform_7, window_bounds = array<i64: 8, 256>}]} {
    %c0 = arith.constant 0 : index
    %c0_0 = arith.constant 0 : index
    %0 = vector.load %arg2[%c0, %c0_0] : memref<8x128xbf16, #tpu.memory_space<vmem>>, vector<8x128xbf16>
    %c0_1 = arith.constant 0 : index
    %c0_2 = arith.constant 0 : index
    %1 = vector.load %arg3[%c0_1, %c0_2] : memref<128x512xbf16, #tpu.memory_space<vmem>>, vector<128x512xbf16>
    %cst = arith.constant dense<0.000000e+00> : vector<8x512xf32>
    %2 = tpu.matmul %0, %1, %cst {dimension_numbers = #tpu.dot_dimension_numbers<[1], [0], [0], [1], [0, 0, 1, 1], [], []>} : vector<8x128xbf16>, vector<128x512xbf16>, vector<8x512xf32> -> vector<8x512xf32>
    %c0_3 = arith.constant 0 : index
    %c0_4 = arith.constant 0 : index
    %3 = vector.load %arg4[%c0_3, %c0_4] : memref<1x512xf32, #tpu.memory_space<vmem>>, vector<1x512xf32>
    %4 = vector.broadcast %3 : vector<1x512xf32> to vector<8x512xf32>
    %5 = arith.addf %2, %4 : vector<8x512xf32>
    %cst_5 = arith.constant 0.000000e+00 : f32
    %6 = vector.broadcast %cst_5 : f32 to vector<8x512xf32>
    %7 = arith.maximumf %5, %6 : vector<8x512xf32>
    %8 = math.absf %5 : vector<8x512xf32>
    %cst_6 = arith.constant 0.000000e+00 : f32
    %9 = vector.broadcast %cst_6 : f32 to vector<8x512xf32>
    %10 = arith.subf %9, %8 : vector<8x512xf32>
    %11 = math.exp %10 : vector<8x512xf32>
    %cst_7 = arith.constant 1.000000e+00 : f32
    %12 = vector.broadcast %cst_7 : f32 to vector<8x512xf32>
    %13 = arith.addf %12, %11 : vector<8x512xf32>
    %14 = math.log %13 : vector<8x512xf32>
    %15 = arith.addf %7, %14 : vector<8x512xf32>
    %16 = arith.truncf %15 : vector<8x512xf32> to vector<8x512xbf16>
    %c0_8 = arith.constant 0 : index
    %c0_9 = arith.constant 0 : index
    %17 = vector.load %arg5[%c0_8, %c0_9] : memref<512x512xbf16, #tpu.memory_space<vmem>>, vector<512x512xbf16>
    %cst_10 = arith.constant dense<0.000000e+00> : vector<8x512xf32>
    %18 = tpu.matmul %16, %17, %cst_10 {dimension_numbers = #tpu.dot_dimension_numbers<[1], [0], [0], [1], [0, 0, 1, 1], [], []>} : vector<8x512xbf16>, vector<512x512xbf16>, vector<8x512xf32> -> vector<8x512xf32>
    %c0_11 = arith.constant 0 : index
    %c0_12 = arith.constant 0 : index
    %19 = vector.load %arg6[%c0_11, %c0_12] : memref<1x512xf32, #tpu.memory_space<vmem>>, vector<1x512xf32>
    %20 = vector.broadcast %19 : vector<1x512xf32> to vector<8x512xf32>
    %21 = arith.addf %18, %20 : vector<8x512xf32>
    %cst_13 = arith.constant 0.000000e+00 : f32
    %22 = vector.broadcast %cst_13 : f32 to vector<8x512xf32>
    %23 = arith.maximumf %21, %22 : vector<8x512xf32>
    %24 = math.absf %21 : vector<8x512xf32>
    %cst_14 = arith.constant 0.000000e+00 : f32
    %25 = vector.broadcast %cst_14 : f32 to vector<8x512xf32>
    %26 = arith.subf %25, %24 : vector<8x512xf32>
    %27 = math.exp %26 : vector<8x512xf32>
    %cst_15 = arith.constant 1.000000e+00 : f32
    %28 = vector.broadcast %cst_15 : f32 to vector<8x512xf32>
    %29 = arith.addf %28, %27 : vector<8x512xf32>
    %30 = math.log %29 : vector<8x512xf32>
    %31 = arith.addf %23, %30 : vector<8x512xf32>
    %32 = arith.truncf %31 : vector<8x512xf32> to vector<8x512xbf16>
    %c0_16 = arith.constant 0 : index
    %c0_17 = arith.constant 0 : index
    %33 = vector.load %arg7[%c0_16, %c0_17] : memref<512x256xbf16, #tpu.memory_space<vmem>>, vector<512x256xbf16>
    %cst_18 = arith.constant dense<0.000000e+00> : vector<8x256xf32>
    %34 = tpu.matmul %32, %33, %cst_18 {dimension_numbers = #tpu.dot_dimension_numbers<[1], [0], [0], [1], [0, 0, 1, 1], [], []>} : vector<8x512xbf16>, vector<512x256xbf16>, vector<8x256xf32> -> vector<8x256xf32>
    %c0_19 = arith.constant 0 : index
    %c0_20 = arith.constant 0 : index
    %35 = vector.load %arg8[%c0_19, %c0_20] : memref<1x256xf32, #tpu.memory_space<vmem>>, vector<1x256xf32>
    %36 = vector.broadcast %35 : vector<1x256xf32> to vector<8x256xf32>
    %37 = arith.addf %34, %36 : vector<8x256xf32>
    %cst_21 = arith.constant 5.000000e-01 : f32
    %38 = vector.broadcast %cst_21 : f32 to vector<8x256xf32>
    %39 = arith.mulf %38, %37 : vector<8x256xf32>
    %40 = math.tanh %39 : vector<8x256xf32>
    %cst_22 = arith.constant 5.000000e-01 : f32
    %41 = vector.broadcast %cst_22 : f32 to vector<8x256xf32>
    %42 = arith.mulf %41, %40 : vector<8x256xf32>
    %cst_23 = arith.constant 5.000000e-01 : f32
    %43 = vector.broadcast %cst_23 : f32 to vector<8x256xf32>
    %44 = arith.addf %42, %43 : vector<8x256xf32>
    %45 = arith.truncf %44 : vector<8x256xf32> to vector<8x256xbf16>
    %c0_24 = arith.constant 0 : index
    %c0_25 = arith.constant 0 : index
    %46 = vector.load %arg9[%c0_24, %c0_25] : memref<8x256xbf16, #tpu.memory_space<vmem>>, vector<8x256xbf16>
    tpu.vector_store %arg9[%c0_24, %c0_25], %45 {strides = array<i32>} : memref<8x256xbf16, #tpu.memory_space<vmem>>, vector<8x256xbf16>,
    return
  }
  func.func @transform_0(%arg0: i32, %arg1: i32) -> (i32, i32) {
    %c0_i32 = arith.constant 0 : i32
    %c0_i32_0 = arith.constant 0 : i32
    return %arg0, %c0_i32 : i32, i32
  }
  func.func @transform_1(%arg0: i32, %arg1: i32) -> (i32, i32) {
    %c0_i32 = arith.constant 0 : i32
    %c0_i32_0 = arith.constant 0 : i32
    %c0_i32_1 = arith.constant 0 : i32
    return %c0_i32, %c0_i32_0 : i32, i32
  }
  func.func @transform_2(%arg0: i32, %arg1: i32) -> (i32, i32) {
    %c0_i32 = arith.constant 0 : i32
    %c0_i32_0 = arith.constant 0 : i32
    %c0_i32_1 = arith.constant 0 : i32
    return %c0_i32, %c0_i32_0 : i32, i32
  }
  func.func @transform_3(%arg0: i32, %arg1: i32) -> (i32, i32) {
    %c0_i32 = arith.constant 0 : i32
    %c0_i32_0 = arith.constant 0 : i32
    %c0_i32_1 = arith.constant 0 : i32
    return %c0_i32, %c0_i32_0 : i32, i32
  }
  func.func @transform_4(%arg0: i32, %arg1: i32) -> (i32, i32) {
    %c0_i32 = arith.constant 0 : i32
    %c0_i32_0 = arith.constant 0 : i32
    %c0_i32_1 = arith.constant 0 : i32
    return %c0_i32, %c0_i32_0 : i32, i32
  }
  func.func @transform_5(%arg0: i32, %arg1: i32) -> (i32, i32) {
    %c0_i32 = arith.constant 0 : i32
    %c0_i32_0 = arith.constant 0 : i32
    return %c0_i32, %arg1 : i32, i32
  }
  func.func @transform_6(%arg0: i32, %arg1: i32) -> (i32, i32) {
    %c0_i32 = arith.constant 0 : i32
    %c0_i32_0 = arith.constant 0 : i32
    return %c0_i32, %arg1 : i32, i32
  }
  func.func @transform_7(%arg0: i32, %arg1: i32) -> (i32, i32) {
    %c0_i32 = arith.constant 0 : i32
    return %arg0, %arg1 : i32, i32
  }
}

</mosaic_0001>

<bundles_post_ra>
// kernel: tpu_custom_call.1
= control target key start
LH: loop header
LB: loop body
LE: loop exit
PB: predicated region body
PF: predicated region fallthrough
CT: control target
= control target key end

     0   :  { %12 = vsyncpa [#allocation3], 0  ;;  %s2818_s0 = inlined_call_operand.hbm [shape: bf16[4,128], index: 0, kind: input, shape index: {}]   ;;  %s2819_s1 = inlined_call_operand.hbm [shape: bf16[128,512], index: 1, kind: input, shape index: {}]   ;;  %s2820_s2 = inlined_call_operand.hbm [shape: f32[1,512], index: 2, kind: input, shape index: {}]   ;;  %s2821_s3 = inlined_call_operand.hbm [shape: bf16[512,512], index: 3, kind: input, shape index: {}]   ;;  %s2822_s4 = inlined_call_operand.vmem [shape: f32[1,512], index: 4, kind: input, shape index: {}]   ;;  %s2823_s5 = inlined_call_operand.hbm [shape: bf16[512,256], index: 5, kind: input, shape index: {}]   ;;  %s2824_s6 = inlined_call_operand.vmem [shape: f32[1,256], index: 6, kind: input, shape index: {}]   ;;  %s2825_s7 = inlined_call_operand.hbm [shape: bf16[4,256], index: 7, kind: output, shape index: {}]  }
   0x1   :  { %13 = vsyncpa [#allocation6], 0 }
   0x2   :  { %14 = vsyncpa [#allocation9], 0 }
   0x3   :  { %15 = vsyncpa [#allocation4], 0 }
   0x4   :  { %20 = vsyncadd [#allocation3], 32  ;;  %s2701_s24 = smov [#allocation5]  }
   0x5   :  { %s33_s25 = sshll.u32 %s2701_s24, 4  ;;  %s34_s25 = int_to_ptr.vmem [resolvable:$true] %s33_s25 }
   0x6   :  { %s2581_s26 = scalar_lea.vmem %s34_s25, 4096  ;;  %p2586_p1 = scmp.lt.s32.totalorder %s34_s25, %s34_s25 }
   0x7   :  { %p2582_p0 = scmp.ne.s32.totalorder %s34_s25, %s2581_s26  ;;  %p2587_p2 = scmp.lt.s32.totalorder %s2581_s26, %s2581_s26 }
   0x9   :  { %p2588_p3 = por %p2587_p2, %p2586_p1 }
   0xb   :  { %p2589_p4 = pnand %p2588_p3, %p2582_p0 }
   0xd   :  { %2592 = shalt.err (!%p2589_p4)
}
   0xe   :  { %s2702_s27 = smov 256   ;;  %s2703_s28 = smov 16  }
   0xf   :  { %39 = dma.hbm_to_vmem [thread:$0]  %s2819_s1, 4096, %s34_s25, [#allocation6], %s2702_s27, %s2702_s27, %s2703_s28  }
  0x10   :  { %s2704_s8 = smov [#allocation8]   ;;  %s2705_s10 = smov [#allocation2]  }
  0x11   :  { %s55_s9 = sshll.u32 %s2704_s8, 4  ;;  %s21_s11 = sshll.u32 %s2705_s10, 4  ;;  %s56_s9 = int_to_ptr.vmem [resolvable:$true] %s55_s9  ;;  %s22_s11 = int_to_ptr.vmem [resolvable:$true] %s21_s11 }
  0x12   :  { %s2601_s12 = scalar_lea.vmem %s56_s9, 16384  ;;  %p2606_p6 = scmp.lt.s32.totalorder %s56_s9, %s56_s9 }
  0x13   :  { %p2602_p5 = scmp.ne.s32.totalorder %s56_s9, %s2601_s12  ;;  %p2607_p7 = scmp.lt.s32.totalorder %s2601_s12, %s2601_s12 }
  0x15   :  { %p2608_p8 = por %p2607_p7, %p2606_p6 }
  0x17   :  { %p2609_p9 = pnand %p2608_p8, %p2602_p5 }
  0x19   :  { %2612 = shalt.err (!%p2609_p9)
}
  0x1a   :  { %61 = dma.hbm_to_vmem [thread:$0]  %s2821_s3, 16384, %s56_s9, [#allocation9], %s2702_s27, %s2702_s27, %s2703_s28  }
  0x1b   :  { %s2621_s15 = scalar_lea.vmem %s22_s11, 32  ;;  %s2625_s1 = scalar_lea.vmem %s22_s11, 64 }
  0x1c   :  { %p2622_p10 = scmp.ne.s32.totalorder %s22_s11, %s2621_s15  ;;  %p2626_p11 = scmp.lt.s32.totalorder %s22_s11, %s22_s11 }
  0x1d   :  { %p2627_p12 = scmp.lt.s32.totalorder %s2625_s1, %s2621_s15 }
  0x1f   :  { %p2628_p13 = por %p2627_p12, %p2626_p11 }
  0x21   :  { %p2629_p0 = pnand %p2628_p13, %p2622_p10 }
  0x23   :  { %2632 = shalt.err (!%p2629_p0)
}
  0x24   :  { %s2706_s16 = smov 32   ;;  %s2707_s17 = smov 2  }
  0x25   :  { %27 = dma.hbm_to_vmem [thread:$0]  %s2818_s0, 32, %s22_s11, [#allocation3], %s2706_s16, %s2706_s16, %s2707_s17  }
  0x26   :  { %s2708_s20 = smov [#allocation7]   ;;  %s2709_s22 = smov [#allocation10]  }
  0x27   :  { %s46_s21 = sshll.u32 %s2708_s20, 4  ;;  %s69_s3 = sshll.u32 %s2709_s22, 4  ;;  %s47_s21 = int_to_ptr.vmem [resolvable:$true] %s46_s21  ;;  %s70_s3 = int_to_ptr.vmem [resolvable:$true] %s69_s3 }
  0x28   :  { %s2641_s23 = scalar_lea.vmem %s47_s21, 64  ;;  %p2646_p2 = scmp.lt.s32.totalorder %s47_s21, %s47_s21 }
  0x29   :  { %p2642_p1 = scmp.ne.s32.totalorder %s47_s21, %s2641_s23  ;;  %p2647_p3 = scmp.lt.s32.totalorder %s2641_s23, %s2641_s23 }
  0x2b   :  { %p2648_p4 = por %p2647_p3, %p2646_p2 }
  0x2d   :  { %p2649_p5 = pnand %p2648_p4, %p2642_p1 }
  0x2f   :  { %2652 = shalt.err (!%p2649_p5)
}
  0x30   :  { %49 = dma.hbm_to_vmem [thread:$0]  %s2820_s2, 64, %s47_s21, [#allocation6]  }
  0x31   :  { %s2661_s26 = scalar_lea.vmem %s70_s3, 8192  ;;  %p2666_p7 = scmp.lt.s32.totalorder %s70_s3, %s70_s3 }
  0x32   :  { %p2662_p6 = scmp.ne.s32.totalorder %s70_s3, %s2661_s26  ;;  %p2667_p8 = scmp.lt.s32.totalorder %s2661_s26, %s2661_s26 }
  0x34   :  { %p2668_p9 = por %p2667_p8, %p2666_p7 }
  0x36   :  { %p2669_p10 = pnand %p2668_p9, %p2662_p6 }
  0x38   :  { %2672 = shalt.err (!%p2669_p10)
}
  0x39   :  { %s2710_s0 = smov 128   ;;  %s2711_s27 = smov 8  }
  0x3a   :  { %75 = dma.hbm_to_vmem [thread:$0]  %s2823_s5, 8192, %s70_s3, [#allocation9], %s2710_s0, %s2710_s0, %s2711_s27  }
  0x3b   :  { %2693 = dma.done.wait [#allocation3], 64  }
  0x3c   :  { %2694 = vsyncadd [#allocation3], 4294967232 }
  0x3d   :  { %2695 = dma.done.wait [#allocation6], 4160  }
  0x3e   :  { %2696 = vsyncadd [#allocation6], 4294963136 }
  0x3f   :  { %2697 = dma.done.wait [#allocation9], 24576  }
  0x40   :  { %2698 = vsyncadd [#allocation9], 4294942720  ;;  %v2712_v0 = vmov 0   ;;  %v2201_v1 = vld [vmem:[#allocation5 + $0xe4] ss:$16 sps:$4 sm:$0xff]   ;;  %v130_v23 = vlaneseq }
  0x41   :  { %353 = vmatprep.mubr.bf16.mxu0 %v2712_v0  ;;  %394 = vmatprep.mubr.bf16.mxu1 %v2712_v0  ;;  %v2203_v2 = vld [vmem:[#allocation5 + $0xec] ss:$16 sps:$4 sm:$0xff]   ;;  %v2205_v3 = vld [vmem:[#allocation5 + $0xe0] ss:$16 sps:$4 sm:$0xff]   ;;  %v2206_v4 = vld [vmem:[#allocation5 + $0xe8] ss:$16 sps:$4 sm:$0xff]  }
  0x42   :  { %321 = vmatprep.subr.bf16.mxu0 %v2201_v1  ;;  %362 = vmatprep.subr.bf16.mxu1 %v2203_v2  ;;  %v2207_v5 = vld [vmem:[#allocation5 + $0xc4] ss:$16 sps:$4 sm:$0xff]   ;;  %v2209_v6 = vld [vmem:[#allocation5 + $0xcc] ss:$16 sps:$4 sm:$0xff]   ;;  %v2211_v7 = vld [vmem:[#allocation5 + $0xc0] ss:$16 sps:$4 sm:$0xff]  }
  0x43   :  { %322 = vmatpush1.bf16.msra.mxu0 %v2205_v3  ;;  %363 = vmatpush1.bf16.msra.mxu1 %v2206_v4  ;;  %v2212_v8 = vld [vmem:[#allocation5 + $0xc8] ss:$16 sps:$4 sm:$0xff]   ;;  %v2213_v9 = vld [vmem:[#allocation5 + $0xa4] ss:$16 sps:$4 sm:$0xff]   ;;  %v2215_v10 = vld [vmem:[#allocation5 + $0xac] ss:$16 sps:$4 sm:$0xff]  }
  0x44   :  { %323 = vmatprep.subr.bf16.mxu0 %v2207_v5  ;;  %364 = vmatprep.subr.bf16.mxu1 %v2209_v6  ;;  %v2217_v11 = vld [vmem:[#allocation5 + $0xa0] ss:$16 sps:$4 sm:$0xff]   ;;  %v2218_v12 = vld [vmem:[#allocation5 + $0xa8] ss:$16 sps:$4 sm:$0xff]   ;;  %v2219_v13 = vld [vmem:[#allocation5 + $0x84] ss:$16 sps:$4 sm:$0xff]  }
  0x45   :  { %v2221_v14 = vld [vmem:[#allocation5 + $0x8c] ss:$16 sps:$4 sm:$0xff]   ;;  %v2223_v15 = vld [vmem:[#allocation5 + $0x80] ss:$16 sps:$4 sm:$0xff]   ;;  %v2224_v16 = vld [vmem:[#allocation5 + $0x88] ss:$16 sps:$4 sm:$0xff]  }
  0x46   :  { %v2225_v17 = vld [vmem:[#allocation5 + $0x64] ss:$16 sps:$4 sm:$0xff]   ;;  %v2227_v18 = vld [vmem:[#allocation5 + $0x6c] ss:$16 sps:$4 sm:$0xff]   ;;  %v2229_v19 = vld [vmem:[#allocation5 + $0x60] ss:$16 sps:$4 sm:$0xff]  }
  0x47   :  { %324 = vmatpush1.bf16.msra.mxu0 %v2211_v7  ;;  %365 = vmatpush1.bf16.msra.mxu1 %v2212_v8  ;;  %v2230_v20 = vld [vmem:[#allocation5 + $0x68] ss:$16 sps:$4 sm:$0xff]   ;;  %v2231_v21 = vld [vmem:[#allocation5 + $0x44] ss:$16 sps:$4 sm:$0xff]   ;;  %v2233_v22 = vld [vmem:[#allocation5 + $0x4c] ss:$16 sps:$4 sm:$0xff]  }
  0x48   :  { %325 = vmatprep.subr.bf16.mxu0 %v2213_v9  ;;  %366 = vmatprep.subr.bf16.mxu1 %v2215_v10  ;;  %v2713_v24 = vmov 1983009808   ;;  %v2235_v26 = vld [vmem:[#allocation5 + $0x40] ss:$16 sps:$4 sm:$0xff]   ;;  %v2236_v27 = vld [vmem:[#allocation5 + $0x48] ss:$16 sps:$4 sm:$0xff]  }
  0x49   :  { %v154_v25 = vunpack.c.l.s4 %v2713_v24  ;;  %v2237_v28 = vld [vmem:[#allocation5 + $0x24] ss:$16 sps:$4 sm:$0xff]   ;;  %v2239_v29 = vld [vmem:[#allocation5 + $0x2c] ss:$16 sps:$4 sm:$0xff]   ;;  %v2241_v30 = vld [vmem:[#allocation5 + $0x20] ss:$16 sps:$4 sm:$0xff]  }
  0x4a   :  { %v2242_v31 = vld [vmem:[#allocation5 + $0x28] ss:$16 sps:$4 sm:$0xff]   ;;  %v2772_v32 = vshrl.u32 %v130_v23, 7  ;;  %v94_v34 = vld [vmem:[#allocation2] sm:$0x3] }
  0x4b   :  { %326 = vmatpush1.bf16.msra.mxu0 %v2217_v11  ;;  %367 = vmatpush1.bf16.msra.mxu1 %v2218_v12  ;;  %v155_v33 = vunpack.c.0.s8 %v154_v25  ;;  %v95_v35 = vld [vmem:[#allocation2 + $0x2] sm:$0x3]  ;;  %v2243_v36 = vld [vmem:[#allocation5 + $0x4] ss:$16 sps:$4 sm:$0xff]   ;;  %v2247_v40 = vld [vmem:[#allocation5] ss:$16 sps:$4 sm:$0xff]  }
  0x4c   :  { %327 = vmatprep.subr.bf16.mxu0 %v2219_v13  ;;  %368 = vmatprep.subr.bf16.mxu1 %v2221_v14  ;;  %v2245_v37 = vld [vmem:[#allocation5 + $0xc] ss:$16 sps:$4 sm:$0xff]   ;;  %v152_v38 = vcombine.low %v94_v34, %v95_v35  ;;  %v2248_v41 = vld [vmem:[#allocation5 + $0x8] ss:$16 sps:$4 sm:$0xff]   ;;  %v2249_v45 = vld [vmem:[#allocation8 + $0xe0] ss:$16 sps:$4 sm:$0xff]  }
  0x4d   :  { %v2775_v39 = vsub.s32 %v155_v33, %v2772_v32  ;;  %v2251_v42 = vld [vmem:[#allocation8 + $0xe4] ss:$16 sps:$4 sm:$0xff]   ;;  %v2252_v46 = vld [vmem:[#allocation8 + $0x2e0] ss:$16 sps:$4 sm:$0xff]  }
  0x4e   :  { %v2254_v43 = vld [vmem:[#allocation8 + $0x2e4] ss:$16 sps:$4 sm:$0xff]   ;;  %v2255_v49 = vld [vmem:[#allocation8 + $0xc0] ss:$16 sps:$4 sm:$0xff]  }
  0x4f   :  { %328 = vmatpush1.bf16.msra.mxu0 %v2223_v15  ;;  %369 = vmatpush1.bf16.msra.mxu1 %v2224_v16  ;;  %v159_v44 = vrot.slane %v152_v38, %v2775_v39  ;;  %v2257_v47 = vld [vmem:[#allocation8 + $0xc4] ss:$16 sps:$4 sm:$0xff]   ;;  %v2258_v50 = vld [vmem:[#allocation8 + $0x2c0] ss:$16 sps:$4 sm:$0xff]  }
  0x50   :  { %329 = vmatprep.subr.bf16.mxu0 %v2225_v17  ;;  %370 = vmatprep.subr.bf16.mxu1 %v2227_v18  ;;  %v2260_v48 = vld [vmem:[#allocation8 + $0x2c4] ss:$16 sps:$4 sm:$0xff]   ;;  %v2261_v53 = vld [vmem:[#allocation8 + $0xa0] ss:$16 sps:$4 sm:$0xff]  }
  0x51   :  { %v2263_v51 = vld [vmem:[#allocation8 + $0xa4] ss:$16 sps:$4 sm:$0xff]   ;;  %v2264_v54 = vld [vmem:[#allocation8 + $0x2a0] ss:$16 sps:$4 sm:$0xff]  }
  0x52   :  { %v2266_v52 = vld [vmem:[#allocation8 + $0x2a4] ss:$16 sps:$4 sm:$0xff]   ;;  %v2267_v57 = vld [vmem:[#allocation8 + $0x80] ss:$16 sps:$4 sm:$0xff]  }
  0x53   :  { %330 = vmatpush1.bf16.msra.mxu0 %v2229_v19  ;;  %371 = vmatpush1.bf16.msra.mxu1 %v2230_v20  ;;  %v2269_v55 = vld [vmem:[#allocation8 + $0x84] ss:$16 sps:$4 sm:$0xff]   ;;  %v2270_v58 = vld [vmem:[#allocation8 + $0x280] ss:$16 sps:$4 sm:$0xff]  }
  0x54   :  { %331 = vmatprep.subr.bf16.mxu0 %v2231_v21  ;;  %372 = vmatprep.subr.bf16.mxu1 %v2233_v22  ;;  %v2272_v56 = vld [vmem:[#allocation8 + $0x284] ss:$16 sps:$4 sm:$0xff]   ;;  %v2273_v61 = vld [vmem:[#allocation8 + $0x60] ss:$16 sps:$4 sm:$0xff]  }
  0x55   :  { %v2275_v59 = vld [vmem:[#allocation8 + $0x64] ss:$16 sps:$4 sm:$0xff]   ;;  %v2276_v62 = vld [vmem:[#allocation8 + $0x260] ss:$16 sps:$4 sm:$0xff]  }
  0x56   :  { %v2278_v60 = vld [vmem:[#allocation8 + $0x264] ss:$16 sps:$4 sm:$0xff]   ;;  %v2279_v1 = vld [vmem:[#allocation8 + $0x40] ss:$16 sps:$4 sm:$0xff]  }
  0x57   :  { %332 = vmatpush1.bf16.msra.mxu0 %v2235_v26  ;;  %373 = vmatpush1.bf16.msra.mxu1 %v2236_v27  ;;  %v2281_v63 = vld [vmem:[#allocation8 + $0x44] ss:$16 sps:$4 sm:$0xff]   ;;  %v2282_v2 = vld [vmem:[#allocation8 + $0x240] ss:$16 sps:$4 sm:$0xff]  }
  0x58   :  { %333 = vmatprep.subr.bf16.mxu0 %v2237_v28  ;;  %374 = vmatprep.subr.bf16.mxu1 %v2239_v29  ;;  %v2284_v0 = vld [vmem:[#allocation8 + $0x244] ss:$16 sps:$4 sm:$0xff]   ;;  %v2285_v5 = vld [vmem:[#allocation8 + $0x20] ss:$16 sps:$4 sm:$0xff]  }
  0x59   :  { %v2287_v3 = vld [vmem:[#allocation8 + $0x24] ss:$16 sps:$4 sm:$0xff]   ;;  %v2288_v6 = vld [vmem:[#allocation8 + $0x220] ss:$16 sps:$4 sm:$0xff]  }
  0x5a   :  { %v2290_v4 = vld [vmem:[#allocation8 + $0x224] ss:$16 sps:$4 sm:$0xff]   ;;  %v2291_v9 = vld [vmem:[#allocation8] ss:$16 sps:$4 sm:$0xff]  }
  0x5b   :  { %334 = vmatpush1.bf16.msra.mxu0 %v2241_v30  ;;  %375 = vmatpush1.bf16.msra.mxu1 %v2242_v31  ;;  %v2293_v7 = vld [vmem:[#allocation8 + $0x4] ss:$16 sps:$4 sm:$0xff]   ;;  %v2294_v10 = vld [vmem:[#allocation8 + $0x200] ss:$16 sps:$4 sm:$0xff]  }
  0x5c   :  { %335 = vmatprep.subr.bf16.mxu0 %v2243_v36  ;;  %376 = vmatprep.subr.bf16.mxu1 %v2245_v37  ;;  %v2296_v8 = vld [vmem:[#allocation8 + $0x204] ss:$16 sps:$4 sm:$0xff]   ;;  %v2297_v13 = vld [vmem:[#allocation8 + $0x1e0] ss:$16 sps:$4 sm:$0xff]  }
  0x5d   :  { %v2299_v11 = vld [vmem:[#allocation8 + $0x1e4] ss:$16 sps:$4 sm:$0xff]   ;;  %v2300_v14 = vld [vmem:[#allocation8 + $0x3e0] ss:$16 sps:$4 sm:$0xff]  }
  0x5e   :  { %v2302_v12 = vld [vmem:[#allocation8 + $0x3e4] ss:$16 sps:$4 sm:$0xff]   ;;  %v2303_v17 = vld [vmem:[#allocation8 + $0x1c0] ss:$16 sps:$4 sm:$0xff]  }
  0x5f   :  { %336 = vmatpush1.bf16.msra.mxu0 %v2247_v40  ;;  %377 = vmatpush1.bf16.msra.mxu1 %v2248_v41  ;;  %v2305_v15 = vld [vmem:[#allocation8 + $0x1c4] ss:$16 sps:$4 sm:$0xff]   ;;  %v2306_v18 = vld [vmem:[#allocation8 + $0x3c0] ss:$16 sps:$4 sm:$0xff]  }
  0x60   :  { %1233 = vmatprep.subr.bf16.mxu0 %v2251_v42  ;;  %1274 = vmatprep.subr.bf16.mxu1 %v2254_v43  ;;  %v2308_v16 = vld [vmem:[#allocation8 + $0x3c4] ss:$16 sps:$4 sm:$0xff]   ;;  %v2309_v21 = vld [vmem:[#allocation8 + $0x1a0] ss:$16 sps:$4 sm:$0xff]  }
  0x61   :  { %v2311_v19 = vld [vmem:[#allocation8 + $0x1a4] ss:$16 sps:$4 sm:$0xff]   ;;  %v2312_v22 = vld [vmem:[#allocation8 + $0x3a0] ss:$16 sps:$4 sm:$0xff]  }
  0x62   :  { %354 = vmatmul.mubr.bf16.vlgmr.msra.gmra.mxu0 %v159_v44  ;;  %395 = vmatmul.mubr.bf16.vlgmr.msra.gmra.mxu1 %v159_v44  ;;  %v2314_v20 = vld [vmem:[#allocation8 + $0x3a4] ss:$16 sps:$4 sm:$0xff]   ;;  %v2315_v25 = vld [vmem:[#allocation8 + $0x180] ss:$16 sps:$4 sm:$0xff]  }
  0x63   :  { %1234 = vmatpush1.bf16.msra.mxu0 %v2249_v45  ;;  %1275 = vmatpush1.bf16.msra.mxu1 %v2252_v46  ;;  %v2317_v23 = vld [vmem:[#allocation8 + $0x184] ss:$16 sps:$4 sm:$0xff]   ;;  %v2318_v26 = vld [vmem:[#allocation8 + $0x380] ss:$16 sps:$4 sm:$0xff]   ;;  %v2347_v45 = vld [vmem:[#allocation8 + $0xec] ss:$16 sps:$4 sm:$0xff]  }
  0x64   :  { %1235 = vmatprep.subr.bf16.mxu0 %v2257_v47  ;;  %1276 = vmatprep.subr.bf16.mxu1 %v2260_v48  ;;  %v2320_v24 = vld [vmem:[#allocation8 + $0x384] ss:$16 sps:$4 sm:$0xff]   ;;  %v2321_v29 = vld [vmem:[#allocation8 + $0x160] ss:$16 sps:$4 sm:$0xff]   ;;  %v2350_v46 = vld [vmem:[#allocation8 + $0x2ec] ss:$16 sps:$4 sm:$0xff]  }
  0x65   :  { %v2323_v27 = vld [vmem:[#allocation8 + $0x164] ss:$16 sps:$4 sm:$0xff]   ;;  %v2324_v30 = vld [vmem:[#allocation8 + $0x360] ss:$16 sps:$4 sm:$0xff]   ;;  %v2779_v47 = vsub.s32 0, %v2772_v32  ;;  %v140_v48 = vsub.s32 2, %v2772_v32 }
  0x66   :  { %v2326_v28 = vld [vmem:[#allocation8 + $0x364] ss:$16 sps:$4 sm:$0xff]   ;;  %v2327_v34 = vld [vmem:[#allocation8 + $0x140] ss:$16 sps:$4 sm:$0xff]  }
  0x67   :  { %1236 = vmatpush1.bf16.msra.mxu0 %v2255_v49  ;;  %1277 = vmatpush1.bf16.msra.mxu1 %v2258_v50  ;;  %v2329_v31 = vld [vmem:[#allocation8 + $0x144] ss:$16 sps:$4 sm:$0xff]   ;;  %v2330_v35 = vld [vmem:[#allocation8 + $0x340] ss:$16 sps:$4 sm:$0xff]   ;;  %v128_v49 = vld [vmem:[#allocation7] sm:$0xf] }
  0x68   :  { %1237 = vmatprep.subr.bf16.mxu0 %v2263_v51  ;;  %1278 = vmatprep.subr.bf16.mxu1 %v2266_v52  ;;  %v2332_v33 = vld [vmem:[#allocation8 + $0x344] ss:$16 sps:$4 sm:$0xff]   ;;  %v2333_v38 = vld [vmem:[#allocation8 + $0x120] ss:$16 sps:$4 sm:$0xff]   ;;  %v2783_v50 = vsub.s32 1, %v2772_v32  ;;  %v144_v51 = vsub.s32 3, %v2772_v32  ;;  %v133_v52 = vrot.slane %v128_v49, %v2779_v47 }
  0x69   :  { %v2335_v36 = vld [vmem:[#allocation8 + $0x124] ss:$16 sps:$4 sm:$0xff]   ;;  %v2336_v40 = vld [vmem:[#allocation8 + $0x320] ss:$16 sps:$4 sm:$0xff]  }
  0x6a   :  { %v2338_v37 = vld [vmem:[#allocation8 + $0x324] ss:$16 sps:$4 sm:$0xff]   ;;  %v2339_v43 = vld [vmem:[#allocation8 + $0x100] ss:$16 sps:$4 sm:$0xff]  }
  0x6b   :  { %1238 = vmatpush1.bf16.msra.mxu0 %v2261_v53  ;;  %1279 = vmatpush1.bf16.msra.mxu1 %v2264_v54  ;;  %v2341_v41 = vld [vmem:[#allocation8 + $0x104] ss:$16 sps:$4 sm:$0xff]   ;;  %v2342_v44 = vld [vmem:[#allocation8 + $0x300] ss:$16 sps:$4 sm:$0xff]   ;;  %v141_v53 = vrot.slane %v128_v49, %v140_v48 }
  0x6c   :  { %1239 = vmatprep.subr.bf16.mxu0 %v2269_v55  ;;  %1280 = vmatprep.subr.bf16.mxu1 %v2272_v56  ;;  %v2344_v42 = vld [vmem:[#allocation8 + $0x304] ss:$16 sps:$4 sm:$0xff]   ;;  %v137_v56 = vrot.slane %v128_v49, %v2783_v50 }
  0x6f   :  { %1240 = vmatpush1.bf16.msra.mxu0 %v2267_v57  ;;  %1281 = vmatpush1.bf16.msra.mxu1 %v2270_v58  ;;  %v145_v57 = vrot.slane %v128_v49, %v144_v51 }
  0x70   :  { %1241 = vmatprep.subr.bf16.mxu0 %v2275_v59  ;;  %1282 = vmatprep.subr.bf16.mxu1 %v2278_v60 }
  0x73   :  { %1242 = vmatpush1.bf16.msra.mxu0 %v2273_v61  ;;  %1283 = vmatpush1.bf16.msra.mxu1 %v2276_v62 }
  0x74   :  { %1243 = vmatprep.subr.bf16.mxu0 %v2281_v63  ;;  %1284 = vmatprep.subr.bf16.mxu1 %v2284_v0 }
  0x77   :  { %1244 = vmatpush1.bf16.msra.mxu0 %v2279_v1  ;;  %1285 = vmatpush1.bf16.msra.mxu1 %v2282_v2 }
  0x78   :  { %1245 = vmatprep.subr.bf16.mxu0 %v2287_v3  ;;  %1286 = vmatprep.subr.bf16.mxu1 %v2290_v4 }
  0x7b   :  { %1246 = vmatpush1.bf16.msra.mxu0 %v2285_v5  ;;  %1287 = vmatpush1.bf16.msra.mxu1 %v2288_v6 }
  0x7c   :  { %1247 = vmatprep.subr.bf16.mxu0 %v2293_v7  ;;  %1288 = vmatprep.subr.bf16.mxu1 %v2296_v8 }
  0x7f   :  { %1248 = vmatpush1.bf16.msra.mxu0 %v2291_v9  ;;  %1289 = vmatpush1.bf16.msra.mxu1 %v2294_v10 }
  0x80   :  { %1249 = vmatprep.subr.bf16.mxu0 %v2299_v11  ;;  %1290 = vmatprep.subr.bf16.mxu1 %v2302_v12 }
  0x83   :  { %1250 = vmatpush2.bf16.msra.mxu0 %v2297_v13  ;;  %1291 = vmatpush2.bf16.msra.mxu1 %v2300_v14 }
  0x84   :  { %1251 = vmatprep.subr.bf16.mxu0 %v2305_v15  ;;  %1292 = vmatprep.subr.bf16.mxu1 %v2308_v16 }
  0x87   :  { %1252 = vmatpush2.bf16.msra.mxu0 %v2303_v17  ;;  %1293 = vmatpush2.bf16.msra.mxu1 %v2306_v18 }
  0x88   :  { %1253 = vmatprep.subr.bf16.mxu0 %v2311_v19  ;;  %1294 = vmatprep.subr.bf16.mxu1 %v2314_v20 }
  0x8b   :  { %1254 = vmatpush2.bf16.msra.mxu0 %v2309_v21  ;;  %1295 = vmatpush2.bf16.msra.mxu1 %v2312_v22 }
  0x8c   :  { %1255 = vmatprep.subr.bf16.mxu0 %v2317_v23  ;;  %1296 = vmatprep.subr.bf16.mxu1 %v2320_v24 }
  0x8f   :  { %1256 = vmatpush2.bf16.msra.mxu0 %v2315_v25  ;;  %1297 = vmatpush2.bf16.msra.mxu1 %v2318_v26 }
  0x90   :  { %1257 = vmatprep.subr.bf16.mxu0 %v2323_v27  ;;  %1298 = vmatprep.subr.bf16.mxu1 %v2326_v28 }
  0x93   :  { %1258 = vmatpush2.bf16.msra.mxu0 %v2321_v29  ;;  %1299 = vmatpush2.bf16.msra.mxu1 %v2324_v30 }
  0x94   :  { %1259 = vmatprep.subr.bf16.mxu0 %v2329_v31  ;;  %1300 = vmatprep.subr.bf16.mxu1 %v2332_v33 }
  0x97   :  { %1260 = vmatpush2.bf16.msra.mxu0 %v2327_v34  ;;  %1301 = vmatpush2.bf16.msra.mxu1 %v2330_v35 }
  0x98   :  { %1261 = vmatprep.subr.bf16.mxu0 %v2335_v36  ;;  %1302 = vmatprep.subr.bf16.mxu1 %v2338_v37 }
  0x9b   :  { %1262 = vmatpush2.bf16.msra.mxu0 %v2333_v38  ;;  %1303 = vmatpush2.bf16.msra.mxu1 %v2336_v40 }
  0x9c   :  { %1263 = vmatprep.subr.bf16.mxu0 %v2341_v41  ;;  %1304 = vmatprep.subr.bf16.mxu1 %v2344_v42 }
  0x9f   :  { %1264 = vmatpush2.bf16.msra.mxu0 %v2339_v43  ;;  %1305 = vmatpush2.bf16.msra.mxu1 %v2342_v44  ;;  %v2345_v43 = vld [vmem:[#allocation8 + $0xe8] ss:$16 sps:$4 sm:$0xff]  }
  0xa0   :  { %1315 = vmatprep.subr.bf16.mxu0 %v2347_v45  ;;  %1356 = vmatprep.subr.bf16.mxu1 %v2350_v46  ;;  %v2348_v46 = vld [vmem:[#allocation8 + $0x2e8] ss:$16 sps:$4 sm:$0xff]  }
 0x122   :  { %v355_v54 = vpop.f32.mrf.mxu0  ;;  %v396_v55 = vpop.f32.mrf.mxu1 }
 0x123   :  { %v356_v58 = vadd.f32 %v355_v54, %v133_v52  ;;  %v397_v59 = vadd.f32 %v396_v55, %v141_v53  ;;  %v2353_v52 = vld [vmem:[#allocation8 + $0xcc] ss:$16 sps:$4 sm:$0xff]   ;;  %v2351_v54 = vld [vmem:[#allocation8 + $0xc8] ss:$16 sps:$4 sm:$0xff]  }
 0x124   :  { %v357_v60 = vpop.f32.mrf.mxu0  ;;  %v398_v61 = vpop.f32.mrf.mxu1  ;;  %v2356_v53 = vld [vmem:[#allocation8 + $0x2cc] ss:$16 sps:$4 sm:$0xff]   ;;  %v2354_v55 = vld [vmem:[#allocation8 + $0x2c8] ss:$16 sps:$4 sm:$0xff]  }
 0x125   :  { %v407_v62 = vand.u32 2147483647, %v356_v58  ;;  %v409_v63 = vand.u32 2147483647, %v397_v59  ;;  %v358_v0 = vadd.f32 %v357_v60, %v137_v56  ;;  %v399_v1 = vadd.f32 %v398_v61, %v145_v57  ;;  %v2359_v56 = vld [vmem:[#allocation8 + $0xac] ss:$16 sps:$4 sm:$0xff]  }
 0x126   :  { %v359_v2 = vpop.f32.mrf.mxu0  ;;  %v400_v3 = vpop.f32.mrf.mxu1  ;;  %v403_v29 = vmax.f32 %v356_v58, 0.0  ;;  %v405_v31 = vmax.f32 %v397_v59, 0.0  ;;  %v2362_v57 = vld [vmem:[#allocation8 + $0x2ac] ss:$16 sps:$4 sm:$0xff]   ;;  %v2357_v58 = vld [vmem:[#allocation8 + $0xa8] ss:$16 sps:$4 sm:$0xff]  }
 0x127   :  { %v411_v4 = vsub.f32 0.0, %v407_v62  ;;  %v413_v5 = vsub.f32 0.0, %v409_v63  ;;  %v408_v6 = vand.u32 2147483647, %v358_v0  ;;  %v410_v7 = vand.u32 2147483647, %v399_v1 }
 0x128   :  { %v360_v8 = vpop.f32.mrf.mxu0  ;;  %v401_v9 = vpop.f32.mrf.mxu1  ;;  %v404_v33 = vmax.f32 %v358_v0, 0.0  ;;  %v406_v36 = vmax.f32 %v399_v1, 0.0  ;;  %v2360_v59 = vld [vmem:[#allocation8 + $0x2a8] ss:$16 sps:$4 sm:$0xff]   ;;  %v2365_v60 = vld [vmem:[#allocation8 + $0x8c] ss:$16 sps:$4 sm:$0xff]  }
 0x129   :  { %v415_v10 = vmul.f32 1.442695, %v411_v4  ;;  %v419_v11 = vmul.f32 1.442695, %v413_v5  ;;  %v412_v12 = vsub.f32 0.0, %v408_v6  ;;  %v414_v13 = vsub.f32 0.0, %v410_v7 }
 0x12a   :  { %v2368_v61 = vld [vmem:[#allocation8 + $0x28c] ss:$16 sps:$4 sm:$0xff]   ;;  %v2363_v62 = vld [vmem:[#allocation8 + $0x88] ss:$16 sps:$4 sm:$0xff]  }
 0x12b   :  { %2537 = vpow2.f32 %v415_v10  ;;  %v417_v14 = vmul.f32 1.442695, %v412_v12  ;;  %v421_v15 = vmul.f32 1.442695, %v414_v13  ;;  %v2366_v63 = vld [vmem:[#allocation8 + $0x288] ss:$16 sps:$4 sm:$0xff]  }
 0x12c   :  { %2539 = vpow2.f32 %v419_v11  ;;  %v2371_v0 = vld [vmem:[#allocation8 + $0x6c] ss:$16 sps:$4 sm:$0xff]   ;;  %v2369_v2 = vld [vmem:[#allocation8 + $0x68] ss:$16 sps:$4 sm:$0xff]  }
 0x12d   :  { %2541 = vpow2.f32 %v417_v14  ;;  %v2374_v1 = vld [vmem:[#allocation8 + $0x26c] ss:$16 sps:$4 sm:$0xff]   ;;  %v2372_v3 = vld [vmem:[#allocation8 + $0x268] ss:$16 sps:$4 sm:$0xff]  }
 0x12e   :  { %2543 = vpow2.f32 %v421_v15  ;;  %v2377_v4 = vld [vmem:[#allocation8 + $0x4c] ss:$16 sps:$4 sm:$0xff]   ;;  %v2375_v6 = vld [vmem:[#allocation8 + $0x48] ss:$16 sps:$4 sm:$0xff]  }
 0x12f   :  { %v2380_v5 = vld [vmem:[#allocation8 + $0x24c] ss:$16 sps:$4 sm:$0xff]   ;;  %v2378_v7 = vld [vmem:[#allocation8 + $0x248] ss:$16 sps:$4 sm:$0xff]  }
 0x130   :  { %v2383_v8 = vld [vmem:[#allocation8 + $0x2c] ss:$16 sps:$4 sm:$0xff]   ;;  %v2381_v10 = vld [vmem:[#allocation8 + $0x28] ss:$16 sps:$4 sm:$0xff]  }
 0x131   :  { %v2386_v9 = vld [vmem:[#allocation8 + $0x22c] ss:$16 sps:$4 sm:$0xff]   ;;  %v2384_v11 = vld [vmem:[#allocation8 + $0x228] ss:$16 sps:$4 sm:$0xff]  }
 0x132   :  { %v2389_v12 = vld [vmem:[#allocation8 + $0xc] ss:$16 sps:$4 sm:$0xff]   ;;  %v2387_v14 = vld [vmem:[#allocation8 + $0x8] ss:$16 sps:$4 sm:$0xff]  }
 0x133   :  { %v2392_v13 = vld [vmem:[#allocation8 + $0x20c] ss:$16 sps:$4 sm:$0xff]   ;;  %v2390_v15 = vld [vmem:[#allocation8 + $0x208] ss:$16 sps:$4 sm:$0xff]  }
 0x138   :  { %v2538_v16 = vpop.eup %2537 }
 0x139   :  { %v2540_v17 = vpop.eup %2539  ;;  %v423_v18 = vadd.f32 1.0, %v2538_v16  ;;  %v2395_v16 = vld [vmem:[#allocation8 + $0x1ec] ss:$16 sps:$4 sm:$0xff]  }
 0x13a   :  { %v425_v19 = vadd.f32 1.0, %v2540_v17  ;;  %v2542_v20 = vpop.eup %2541  ;;  %v2398_v17 = vld [vmem:[#allocation8 + $0x3ec] ss:$16 sps:$4 sm:$0xff]  }
 0x13b   :  { %2545 = vlog2.f32 %v423_v18  ;;  %v2544_v21 = vpop.eup %2543  ;;  %v424_v22 = vadd.f32 1.0, %v2542_v20  ;;  %v2393_v18 = vld [vmem:[#allocation8 + $0x1e8] ss:$16 sps:$4 sm:$0xff]   ;;  %v2401_v20 = vld [vmem:[#allocation8 + $0x1cc] ss:$16 sps:$4 sm:$0xff]  }
 0x13c   :  { %2547 = vlog2.f32 %v425_v19  ;;  %v426_v23 = vadd.f32 1.0, %v2544_v21  ;;  %v2396_v19 = vld [vmem:[#allocation8 + $0x3e8] ss:$16 sps:$4 sm:$0xff]   ;;  %v2404_v21 = vld [vmem:[#allocation8 + $0x3cc] ss:$16 sps:$4 sm:$0xff]  }
 0x13d   :  { %2549 = vlog2.f32 %v424_v22  ;;  %v2399_v22 = vld [vmem:[#allocation8 + $0x1c8] ss:$16 sps:$4 sm:$0xff]  }
 0x13e   :  { %2551 = vlog2.f32 %v426_v23  ;;  %v2402_v23 = vld [vmem:[#allocation8 + $0x3c8] ss:$16 sps:$4 sm:$0xff]  }
 0x148   :  { %v2546_v24 = vpop.eup %2545 }
 0x149   :  { %v2548_v25 = vpop.eup %2547  ;;  %v428_v26 = vmul.f32 0.6931472, %v2546_v24  ;;  %v2407_v24 = vld [vmem:[#allocation8 + $0x1ac] ss:$16 sps:$4 sm:$0xff]  }
 0x14a   :  { %v432_v27 = vmul.f32 0.6931472, %v2548_v25  ;;  %v2550_v28 = vpop.eup %2549  ;;  %v2410_v25 = vld [vmem:[#allocation8 + $0x3ac] ss:$16 sps:$4 sm:$0xff]  }
 0x14b   :  { %v2552_v30 = vpop.eup %2551  ;;  %v430_v34 = vmul.f32 0.6931472, %v2550_v28  ;;  %v435_v35 = vadd.f32 %v428_v26, %v403_v29  ;;  %v2405_v26 = vld [vmem:[#allocation8 + $0x1a8] ss:$16 sps:$4 sm:$0xff]   ;;  %v2413_v28 = vld [vmem:[#allocation8 + $0x18c] ss:$16 sps:$4 sm:$0xff]  }
 0x14c   :  { %v434_v37 = vmul.f32 0.6931472, %v2552_v30  ;;  %v437_v38 = vadd.f32 %v432_v27, %v405_v31  ;;  %v2408_v27 = vld [vmem:[#allocation8 + $0x3a8] ss:$16 sps:$4 sm:$0xff]   ;;  %v2416_v29 = vld [vmem:[#allocation8 + $0x38c] ss:$16 sps:$4 sm:$0xff]  }
 0x14d   :  { %v436_v40 = vadd.f32 %v430_v34, %v404_v33  ;;  %v2792_v44 = vpack.c.bf16 %v435_v35, %v435_v35  ;;  %v2411_v30 = vld [vmem:[#allocation8 + $0x188] ss:$16 sps:$4 sm:$0xff]   ;;  %v2419_v33 = vld [vmem:[#allocation8 + $0x16c] ss:$16 sps:$4 sm:$0xff]  }
 0x14e   :  { %v438_v41 = vadd.f32 %v434_v37, %v406_v36  ;;  %v2794_v49 = vpack.c.bf16 %v437_v38, %v437_v38  ;;  %v2414_v31 = vld [vmem:[#allocation8 + $0x388] ss:$16 sps:$4 sm:$0xff]   ;;  %v2422_v34 = vld [vmem:[#allocation8 + $0x36c] ss:$16 sps:$4 sm:$0xff]  }
 0x14f   :  { %v440_v42 = vpack.c.bf16 %v436_v40, %v436_v40  ;;  %v2417_v35 = vld [vmem:[#allocation8 + $0x168] ss:$16 sps:$4 sm:$0xff]   ;;  %v2425_v37 = vld [vmem:[#allocation8 + $0x14c] ss:$16 sps:$4 sm:$0xff]  }
 0x150   :  { %v442_v45 = vpack.c.bf16 %v438_v41, %v438_v41  ;;  %v2420_v36 = vld [vmem:[#allocation8 + $0x368] ss:$16 sps:$4 sm:$0xff]   ;;  %v2428_v38 = vld [vmem:[#allocation8 + $0x34c] ss:$16 sps:$4 sm:$0xff]  }
 0x151   :  { %1265 = vmatprep.mubr.bf16.mxu0 %v440_v42  ;;  %v2423_v40 = vld [vmem:[#allocation8 + $0x148] ss:$16 sps:$4 sm:$0xff]  }
 0x152   :  { %1306 = vmatprep.mubr.bf16.mxu1 %v442_v45  ;;  %1266 = vmatmul.mubr.bf16.vlgmr.msra.gmra.mxu0 %v2792_v44  ;;  %v2426_v41 = vld [vmem:[#allocation8 + $0x348] ss:$16 sps:$4 sm:$0xff]  }
 0x153   :  { %1307 = vmatmul.mubr.bf16.vlgmr.msra.gmra.mxu1 %v2794_v49  ;;  %1316 = vmatpush1.bf16.msra.mxu0 %v2345_v43  ;;  %v2434_v43 = vld [vmem:[#allocation8 + $0x32c] ss:$16 sps:$4 sm:$0xff]  }
 0x154   :  { %1357 = vmatpush1.bf16.msra.mxu1 %v2348_v46  ;;  %1347 = vmatprep.mubr.bf16.mxu0 %v440_v42  ;;  %v2431_v42 = vld [vmem:[#allocation8 + $0x12c] ss:$16 sps:$4 sm:$0xff]   ;;  %v2432_v46 = vld [vmem:[#allocation8 + $0x328] ss:$16 sps:$4 sm:$0xff]  }
 0x155   :  { %1388 = vmatprep.mubr.bf16.mxu1 %v442_v45  ;;  %1317 = vmatprep.subr.bf16.mxu0 %v2353_v52  ;;  %v2429_v45 = vld [vmem:[#allocation8 + $0x128] ss:$16 sps:$4 sm:$0xff]   ;;  %v2437_v52 = vld [vmem:[#allocation8 + $0x10c] ss:$16 sps:$4 sm:$0xff]  }
 0x156   :  { %1358 = vmatprep.subr.bf16.mxu1 %v2356_v53  ;;  %v2440_v53 = vld [vmem:[#allocation8 + $0x30c] ss:$16 sps:$4 sm:$0xff]  }
 0x157   :  { %1318 = vmatpush1.bf16.msra.mxu0 %v2351_v54  ;;  %v2435_v54 = vld [vmem:[#allocation8 + $0x108] ss:$16 sps:$4 sm:$0xff]  }
 0x158   :  { %1359 = vmatpush1.bf16.msra.mxu1 %v2354_v55  ;;  %1319 = vmatprep.subr.bf16.mxu0 %v2359_v56  ;;  %v2438_v55 = vld [vmem:[#allocation8 + $0x308] ss:$16 sps:$4 sm:$0xff]   ;;  %v2443_v56 = vld [vmem:[#allocation10 + $0x74] ss:$8 sps:$4 sm:$0xff]  }
 0x159   :  { %1360 = vmatprep.subr.bf16.mxu1 %v2362_v57  ;;  %v2441_v57 = vld [vmem:[#allocation10 + $0x70] ss:$8 sps:$4 sm:$0xff]  }
 0x15b   :  { %1320 = vmatpush1.bf16.msra.mxu0 %v2357_v58  ;;  %v2446_v58 = vld [vmem:[#allocation10 + $0x64] ss:$8 sps:$4 sm:$0xff]  }
 0x15c   :  { %1361 = vmatpush1.bf16.msra.mxu1 %v2360_v59  ;;  %1321 = vmatprep.subr.bf16.mxu0 %v2365_v60  ;;  %v2444_v59 = vld [vmem:[#allocation10 + $0x60] ss:$8 sps:$4 sm:$0xff]   ;;  %v2449_v60 = vld [vmem:[#allocation10 + $0x54] ss:$8 sps:$4 sm:$0xff]  }
 0x15d   :  { %1362 = vmatprep.subr.bf16.mxu1 %v2368_v61  ;;  %v2447_v61 = vld [vmem:[#allocation10 + $0x50] ss:$8 sps:$4 sm:$0xff]  }
 0x15f   :  { %1322 = vmatpush1.bf16.msra.mxu0 %v2363_v62  ;;  %v2452_v62 = vld [vmem:[#allocation10 + $0x44] ss:$8 sps:$4 sm:$0xff]  }
 0x160   :  { %1363 = vmatpush1.bf16.msra.mxu1 %v2366_v63  ;;  %1323 = vmatprep.subr.bf16.mxu0 %v2371_v0  ;;  %v2450_v63 = vld [vmem:[#allocation10 + $0x40] ss:$8 sps:$4 sm:$0xff]   ;;  %v2455_v0 = vld [vmem:[#allocation10 + $0x34] ss:$8 sps:$4 sm:$0xff]  }
 0x161   :  { %1364 = vmatprep.subr.bf16.mxu1 %v2374_v1  ;;  %v2453_v1 = vld [vmem:[#allocation10 + $0x30] ss:$8 sps:$4 sm:$0xff]  }
 0x163   :  { %1324 = vmatpush1.bf16.msra.mxu0 %v2369_v2  ;;  %v2458_v2 = vld [vmem:[#allocation10 + $0x24] ss:$8 sps:$4 sm:$0xff]  }
 0x164   :  { %1365 = vmatpush1.bf16.msra.mxu1 %v2372_v3  ;;  %1325 = vmatprep.subr.bf16.mxu0 %v2377_v4  ;;  %v2459_v3 = vld [vmem:[#allocation10 + $0x10] ss:$8 sps:$4 sm:$0xff]   ;;  %v2464_v4 = vld [vmem:[#allocation10 + $0x4] ss:$8 sps:$4 sm:$0xff]  }
 0x165   :  { %1366 = vmatprep.subr.bf16.mxu1 %v2380_v5  ;;  %v2462_v5 = vld [vmem:[#allocation10] ss:$8 sps:$4 sm:$0xff]  }
 0x167   :  { %1326 = vmatpush1.bf16.msra.mxu0 %v2375_v6  ;;  %v2467_v6 = vld [vmem:[#allocation10 + $0xf4] ss:$8 sps:$4 sm:$0xff]  }
 0x168   :  { %1367 = vmatpush1.bf16.msra.mxu1 %v2378_v7  ;;  %1327 = vmatprep.subr.bf16.mxu0 %v2383_v8  ;;  %v2465_v7 = vld [vmem:[#allocation10 + $0xf0] ss:$8 sps:$4 sm:$0xff]   ;;  %v2470_v8 = vld [vmem:[#allocation10 + $0xe4] ss:$8 sps:$4 sm:$0xff]  }
 0x169   :  { %1368 = vmatprep.subr.bf16.mxu1 %v2386_v9  ;;  %v2468_v9 = vld [vmem:[#allocation10 + $0xe0] ss:$8 sps:$4 sm:$0xff]  }
 0x16b   :  { %1328 = vmatpush1.bf16.msra.mxu0 %v2381_v10  ;;  %v2473_v10 = vld [vmem:[#allocation10 + $0xd4] ss:$8 sps:$4 sm:$0xff]  }
 0x16c   :  { %1369 = vmatpush1.bf16.msra.mxu1 %v2384_v11  ;;  %1329 = vmatprep.subr.bf16.mxu0 %v2389_v12  ;;  %v2471_v11 = vld [vmem:[#allocation10 + $0xd0] ss:$8 sps:$4 sm:$0xff]   ;;  %v2476_v12 = vld [vmem:[#allocation10 + $0xc4] ss:$8 sps:$4 sm:$0xff]  }
 0x16d   :  { %1370 = vmatprep.subr.bf16.mxu1 %v2392_v13  ;;  %v2474_v13 = vld [vmem:[#allocation10 + $0xc0] ss:$8 sps:$4 sm:$0xff]  }
 0x16f   :  { %1330 = vmatpush1.bf16.msra.mxu0 %v2387_v14  ;;  %v2479_v14 = vld [vmem:[#allocation10 + $0xb4] ss:$8 sps:$4 sm:$0xff]  }
 0x170   :  { %1371 = vmatpush1.bf16.msra.mxu1 %v2390_v15  ;;  %1331 = vmatprep.subr.bf16.mxu0 %v2395_v16  ;;  %v2477_v15 = vld [vmem:[#allocation10 + $0xb0] ss:$8 sps:$4 sm:$0xff]   ;;  %v2482_v16 = vld [vmem:[#allocation10 + $0xa4] ss:$8 sps:$4 sm:$0xff]  }
 0x171   :  { %1372 = vmatprep.subr.bf16.mxu1 %v2398_v17  ;;  %v2480_v17 = vld [vmem:[#allocation10 + $0xa0] ss:$8 sps:$4 sm:$0xff]  }
 0x173   :  { %1332 = vmatpush2.bf16.msra.mxu0 %v2393_v18  ;;  %v2489_v18 = vld [vmem:[#allocation10 + $0x170] ss:$8 sps:$4 sm:$0xff]  }
 0x174   :  { %1373 = vmatpush2.bf16.msra.mxu1 %v2396_v19  ;;  %1333 = vmatprep.subr.bf16.mxu0 %v2401_v20  ;;  %v2491_v19 = vld [vmem:[#allocation10 + $0x174] ss:$8 sps:$4 sm:$0xff]  }
 0x175   :  { %1374 = vmatprep.subr.bf16.mxu1 %v2404_v21  ;;  %v2485_v20 = vld [vmem:[#allocation10 + $0x94] ss:$8 sps:$4 sm:$0xff]   ;;  %v2494_v21 = vld [vmem:[#allocation10 + $0x164] ss:$8 sps:$4 sm:$0xff]  }
 0x177   :  { %1334 = vmatpush2.bf16.msra.mxu0 %v2399_v22  ;;  %v2492_v22 = vld [vmem:[#allocation10 + $0x160] ss:$8 sps:$4 sm:$0xff]  }
 0x178   :  { %1375 = vmatpush2.bf16.msra.mxu1 %v2402_v23  ;;  %1335 = vmatprep.subr.bf16.mxu0 %v2407_v24  ;;  %v2483_v23 = vld [vmem:[#allocation10 + $0x90] ss:$8 sps:$4 sm:$0xff]   ;;  %v2497_v24 = vld [vmem:[#allocation10 + $0x154] ss:$8 sps:$4 sm:$0xff]  }
 0x179   :  { %1376 = vmatprep.subr.bf16.mxu1 %v2410_v25  ;;  %v2488_v25 = vld [vmem:[#allocation10 + $0x84] ss:$8 sps:$4 sm:$0xff]  }
 0x17b   :  { %1336 = vmatpush2.bf16.msra.mxu0 %v2405_v26  ;;  %v2495_v26 = vld [vmem:[#allocation10 + $0x150] ss:$8 sps:$4 sm:$0xff]  }
 0x17c   :  { %1377 = vmatpush2.bf16.msra.mxu1 %v2408_v27  ;;  %1337 = vmatprep.subr.bf16.mxu0 %v2413_v28  ;;  %v2486_v27 = vld [vmem:[#allocation10 + $0x80] ss:$8 sps:$4 sm:$0xff]   ;;  %v2500_v28 = vld [vmem:[#allocation10 + $0x144] ss:$8 sps:$4 sm:$0xff]  }
 0x17d   :  { %1378 = vmatprep.subr.bf16.mxu1 %v2416_v29  ;;  %v2498_v29 = vld [vmem:[#allocation10 + $0x140] ss:$8 sps:$4 sm:$0xff]  }
 0x17f   :  { %1338 = vmatpush2.bf16.msra.mxu0 %v2411_v30  ;;  %v2503_v30 = vld [vmem:[#allocation10 + $0x134] ss:$8 sps:$4 sm:$0xff]  }
 0x180   :  { %1379 = vmatpush2.bf16.msra.mxu1 %v2414_v31  ;;  %1339 = vmatprep.subr.bf16.mxu0 %v2419_v33  ;;  %v2501_v31 = vld [vmem:[#allocation10 + $0x130] ss:$8 sps:$4 sm:$0xff]   ;;  %v2506_v33 = vld [vmem:[#allocation10 + $0x124] ss:$8 sps:$4 sm:$0xff]  }
 0x181   :  { %1380 = vmatprep.subr.bf16.mxu1 %v2422_v34  ;;  %v2504_v34 = vld [vmem:[#allocation10 + $0x120] ss:$8 sps:$4 sm:$0xff]  }
 0x183   :  { %1340 = vmatpush2.bf16.msra.mxu0 %v2417_v35  ;;  %v2509_v35 = vld [vmem:[#allocation10 + $0x114] ss:$8 sps:$4 sm:$0xff]  }
 0x184   :  { %1381 = vmatpush2.bf16.msra.mxu1 %v2420_v36  ;;  %1341 = vmatprep.subr.bf16.mxu0 %v2425_v37  ;;  %v2507_v36 = vld [vmem:[#allocation10 + $0x110] ss:$8 sps:$4 sm:$0xff]   ;;  %v2512_v37 = vld [vmem:[#allocation10 + $0x104] ss:$8 sps:$4 sm:$0xff]  }
 0x185   :  { %1382 = vmatprep.subr.bf16.mxu1 %v2428_v38  ;;  %v2510_v38 = vld [vmem:[#allocation10 + $0x100] ss:$8 sps:$4 sm:$0xff]  }
 0x187   :  { %1342 = vmatpush2.bf16.msra.mxu0 %v2423_v40  ;;  %v2515_v40 = vld [vmem:[#allocation10 + $0x1f4] ss:$8 sps:$4 sm:$0xff]  }
 0x188   :  { %1383 = vmatpush2.bf16.msra.mxu1 %v2426_v41  ;;  %1343 = vmatprep.subr.bf16.mxu0 %v2431_v42  ;;  %v2513_v41 = vld [vmem:[#allocation10 + $0x1f0] ss:$8 sps:$4 sm:$0xff]   ;;  %v2518_v42 = vld [vmem:[#allocation10 + $0x1e4] ss:$8 sps:$4 sm:$0xff]  }
 0x189   :  { %1384 = vmatprep.subr.bf16.mxu1 %v2434_v43  ;;  %v2516_v43 = vld [vmem:[#allocation10 + $0x1e0] ss:$8 sps:$4 sm:$0xff]  }
 0x18b   :  { %1344 = vmatpush2.bf16.msra.mxu0 %v2429_v45  ;;  %v2521_v45 = vld [vmem:[#allocation10 + $0x1d4] ss:$8 sps:$4 sm:$0xff]  }
 0x18c   :  { %1385 = vmatpush2.bf16.msra.mxu1 %v2432_v46  ;;  %1345 = vmatprep.subr.bf16.mxu0 %v2437_v52  ;;  %v2519_v46 = vld [vmem:[#allocation10 + $0x1d0] ss:$8 sps:$4 sm:$0xff]   ;;  %v2524_v52 = vld [vmem:[#allocation10 + $0x1c4] ss:$8 sps:$4 sm:$0xff]  }
 0x18d   :  { %1386 = vmatprep.subr.bf16.mxu1 %v2440_v53  ;;  %v2522_v53 = vld [vmem:[#allocation10 + $0x1c0] ss:$8 sps:$4 sm:$0xff]  }
 0x18f   :  { %1346 = vmatpush2.bf16.msra.mxu0 %v2435_v54  ;;  %v2527_v54 = vld [vmem:[#allocation10 + $0x1b4] ss:$8 sps:$4 sm:$0xff]  }
 0x190   :  { %1387 = vmatpush2.bf16.msra.mxu1 %v2438_v55  ;;  %1833 = vmatprep.subr.bf16.mxu0 %v2443_v56  ;;  %v2525_v55 = vld [vmem:[#allocation10 + $0x1b0] ss:$8 sps:$4 sm:$0xff]   ;;  %v2530_v56 = vld [vmem:[#allocation10 + $0x1a4] ss:$8 sps:$4 sm:$0xff]  }
 0x191   :  { %1874 = vmatprep.subr.bf16.mxu1 %v2491_v19 }
 0x192   :  { %1348 = vmatmul.mubr.bf16.vlgmr.msra.gmra.mxu0 %v2792_v44  ;;  %v2456_v44 = vld [vmem:[#allocation10 + $0x20] ss:$8 sps:$4 sm:$0xff]  }
 0x193   :  { %1389 = vmatmul.mubr.bf16.vlgmr.msra.gmra.mxu1 %v2794_v49  ;;  %1834 = vmatpush1.bf16.msra.mxu0 %v2441_v57  ;;  %v2461_v49 = vld [vmem:[#allocation10 + $0x14] ss:$8 sps:$4 sm:$0xff]   ;;  %v2528_v57 = vld [vmem:[#allocation10 + $0x1a0] ss:$8 sps:$4 sm:$0xff]  }
 0x194   :  { %1835 = vmatprep.subr.bf16.mxu0 %v2446_v58  ;;  %1875 = vmatpush1.bf16.msra.mxu1 %v2489_v18  ;;  %v2533_v58 = vld [vmem:[#allocation10 + $0x194] ss:$8 sps:$4 sm:$0xff]  }
 0x195   :  { %1876 = vmatprep.subr.bf16.mxu1 %v2494_v21 }
 0x197   :  { %1836 = vmatpush1.bf16.msra.mxu0 %v2444_v59  ;;  %v2531_v59 = vld [vmem:[#allocation10 + $0x190] ss:$8 sps:$4 sm:$0xff]  }
 0x198   :  { %1837 = vmatprep.subr.bf16.mxu0 %v2449_v60  ;;  %1877 = vmatpush1.bf16.msra.mxu1 %v2492_v22  ;;  %v2534_v60 = vld [vmem:[#allocation10 + $0x180] ss:$8 sps:$4 sm:$0xff]  }
 0x199   :  { %1878 = vmatprep.subr.bf16.mxu1 %v2497_v24 }
 0x19b   :  { %1838 = vmatpush1.bf16.msra.mxu0 %v2447_v61  ;;  %v2536_v61 = vld [vmem:[#allocation10 + $0x184] ss:$8 sps:$4 sm:$0xff]  }
 0x19c   :  { %1839 = vmatprep.subr.bf16.mxu0 %v2452_v62  ;;  %1879 = vmatpush1.bf16.msra.mxu1 %v2495_v26  ;;  %v571_v62 = vld [vmem:[%s2822_s4] sm:$0xf] }
 0x19d   :  { %1880 = vmatprep.subr.bf16.mxu1 %v2500_v28 }
 0x19f   :  { %1840 = vmatpush1.bf16.msra.mxu0 %v2450_v63  ;;  %v576_v63 = vrot.slane %v571_v62, %v2779_v47 }
 0x1a0   :  { %1841 = vmatprep.subr.bf16.mxu0 %v2455_v0  ;;  %1881 = vmatpush1.bf16.msra.mxu1 %v2498_v29  ;;  %v580_v0 = vrot.slane %v571_v62, %v2783_v50 }
 0x1a1   :  { %1882 = vmatprep.subr.bf16.mxu1 %v2503_v30 }
 0x1a3   :  { %1842 = vmatpush1.bf16.msra.mxu0 %v2453_v1 }
 0x1a4   :  { %1843 = vmatprep.subr.bf16.mxu0 %v2458_v2  ;;  %1883 = vmatpush1.bf16.msra.mxu1 %v2501_v31  ;;  %v584_v31 = vrot.slane %v571_v62, %v140_v48 }
 0x1a5   :  { %1884 = vmatprep.subr.bf16.mxu1 %v2506_v33  ;;  %v588_v33 = vrot.slane %v571_v62, %v144_v51 }
 0x1a7   :  { %1844 = vmatpush1.bf16.msra.mxu0 %v2456_v44 }
 0x1a8   :  { %1845 = vmatprep.subr.bf16.mxu0 %v2461_v49  ;;  %1885 = vmatpush1.bf16.msra.mxu1 %v2504_v34 }
 0x1a9   :  { %1886 = vmatprep.subr.bf16.mxu1 %v2509_v35 }
 0x1ab   :  { %1846 = vmatpush1.bf16.msra.mxu0 %v2459_v3 }
 0x1ac   :  { %1847 = vmatprep.subr.bf16.mxu0 %v2464_v4  ;;  %1887 = vmatpush1.bf16.msra.mxu1 %v2507_v36 }
 0x1ad   :  { %1888 = vmatprep.subr.bf16.mxu1 %v2512_v37 }
 0x1af   :  { %1848 = vmatpush1.bf16.msra.mxu0 %v2462_v5 }
 0x1b0   :  { %1849 = vmatprep.subr.bf16.mxu0 %v2467_v6  ;;  %1889 = vmatpush1.bf16.msra.mxu1 %v2510_v38 }
 0x1b1   :  { %1890 = vmatprep.subr.bf16.mxu1 %v2515_v40 }
 0x1b3   :  { %1850 = vmatpush2.bf16.msra.mxu0 %v2465_v7 }
 0x1b4   :  { %1851 = vmatprep.subr.bf16.mxu0 %v2470_v8  ;;  %1891 = vmatpush2.bf16.msra.mxu1 %v2513_v41 }
 0x1b5   :  { %1892 = vmatprep.subr.bf16.mxu1 %v2518_v42 }
 0x1b7   :  { %1852 = vmatpush2.bf16.msra.mxu0 %v2468_v9 }
 0x1b8   :  { %1853 = vmatprep.subr.bf16.mxu0 %v2473_v10  ;;  %1893 = vmatpush2.bf16.msra.mxu1 %v2516_v43 }
 0x1b9   :  { %1894 = vmatprep.subr.bf16.mxu1 %v2521_v45 }
 0x1bb   :  { %1854 = vmatpush2.bf16.msra.mxu0 %v2471_v11 }
 0x1bc   :  { %1855 = vmatprep.subr.bf16.mxu0 %v2476_v12  ;;  %1895 = vmatpush2.bf16.msra.mxu1 %v2519_v46 }
 0x1bd   :  { %1896 = vmatprep.subr.bf16.mxu1 %v2524_v52 }
 0x1bf   :  { %1856 = vmatpush2.bf16.msra.mxu0 %v2474_v13 }
 0x1c0   :  { %1857 = vmatprep.subr.bf16.mxu0 %v2479_v14  ;;  %1897 = vmatpush2.bf16.msra.mxu1 %v2522_v53 }
 0x1c1   :  { %1898 = vmatprep.subr.bf16.mxu1 %v2527_v54 }
 0x1c3   :  { %1858 = vmatpush2.bf16.msra.mxu0 %v2477_v15 }
 0x1c4   :  { %1859 = vmatprep.subr.bf16.mxu0 %v2482_v16  ;;  %1899 = vmatpush2.bf16.msra.mxu1 %v2525_v55 }
 0x1c5   :  { %1900 = vmatprep.subr.bf16.mxu1 %v2530_v56 }
 0x1c7   :  { %1860 = vmatpush2.bf16.msra.mxu0 %v2480_v17 }
 0x1c8   :  { %1861 = vmatprep.subr.bf16.mxu0 %v2485_v20  ;;  %1901 = vmatpush2.bf16.msra.mxu1 %v2528_v57 }
 0x1c9   :  { %1902 = vmatprep.subr.bf16.mxu1 %v2533_v58 }
 0x1cb   :  { %1862 = vmatpush2.bf16.msra.mxu0 %v2483_v23 }
 0x1cc   :  { %1863 = vmatprep.subr.bf16.mxu0 %v2488_v25  ;;  %1903 = vmatpush2.bf16.msra.mxu1 %v2531_v59 }
 0x1cd   :  { %1904 = vmatprep.subr.bf16.mxu1 %v2536_v61 }
 0x1cf   :  { %1864 = vmatpush2.bf16.msra.mxu0 %v2486_v27 }
 0x1d0   :  { %1905 = vmatpush2.bf16.msra.mxu1 %v2534_v60 }
 0x212   :  { %v1267_v1 = vpop.f32.mrf.mxu0 }
 0x213   :  { %v1268_v2 = vadd.f32 %v1267_v1, %v576_v63  ;;  %v1308_v44 = vpop.f32.mrf.mxu1 }
 0x214   :  { %v1269_v49 = vpop.f32.mrf.mxu0 }
 0x215   :  { %v1309_v3 = vadd.f32 %v1308_v44, %v1268_v2  ;;  %v1270_v4 = vadd.f32 %v1269_v49, %v580_v0  ;;  %v1310_v5 = vpop.f32.mrf.mxu1 }
 0x216   :  { %v1271_v6 = vpop.f32.mrf.mxu0 }
 0x217   :  { %v1401_v7 = vand.u32 2147483647, %v1309_v3  ;;  %v1311_v8 = vadd.f32 %v1310_v5, %v1270_v4  ;;  %v1312_v9 = vpop.f32.mrf.mxu1  ;;  %v1397_v24 = vmax.f32 %v1309_v3, 0.0 }
 0x218   :  { %v1272_v10 = vpop.f32.mrf.mxu0 }
 0x219   :  { %v1405_v11 = vsub.f32 0.0, %v1401_v7  ;;  %v1402_v12 = vand.u32 2147483647, %v1311_v8  ;;  %v1313_v13 = vpop.f32.mrf.mxu1  ;;  %v1398_v25 = vmax.f32 %v1311_v8, 0.0  ;;  %v1501_v8 = vld [vmem:[%s2824_s6] sm:$0x3] }
 0x21a   :  { %v1506_v9 = vrot.slane %v1501_v8, %v2779_v47  ;;  %v1510_v10 = vrot.slane %v1501_v8, %v2783_v50 }
 0x21b   :  { %v1409_v14 = vmul.f32 1.442695, %v1405_v11  ;;  %v1406_v15 = vsub.f32 0.0, %v1402_v12 }
 0x21d   :  { %2553 = vpow2.f32 %v1409_v14  ;;  %v1411_v16 = vmul.f32 1.442695, %v1406_v15 }
 0x21f   :  { %2555 = vpow2.f32 %v1411_v16 }
 0x22a   :  { %v2554_v17 = vpop.eup %2553 }
 0x22b   :  { %v1417_v18 = vadd.f32 1.0, %v2554_v17 }
 0x22c   :  { %v2556_v19 = vpop.eup %2555 }
 0x22d   :  { %2557 = vlog2.f32 %v1417_v18  ;;  %v1418_v20 = vadd.f32 1.0, %v2556_v19 }
 0x22f   :  { %2559 = vlog2.f32 %v1418_v20 }
 0x23a   :  { %v2558_v21 = vpop.eup %2557 }
 0x23b   :  { %v1422_v22 = vmul.f32 0.6931472, %v2558_v21 }
 0x23c   :  { %v2560_v23 = vpop.eup %2559 }
 0x23d   :  { %v1424_v26 = vmul.f32 0.6931472, %v2560_v23  ;;  %v1429_v27 = vadd.f32 %v1422_v22, %v1397_v24 }
 0x23f   :  { %v1430_v28 = vadd.f32 %v1424_v26, %v1398_v25  ;;  %v1433_v30 = vpack.c.bf16 %v1429_v27, %v1429_v27 }
 0x241   :  { %v1434_v29 = vpack.c.bf16 %v1430_v28, %v1430_v28 }
 0x243   :  { %1865 = vmatprep.mubr.bf16.mxu0 %v1434_v29 }
 0x244   :  { %1866 = vmatmul.mubr.bf16.vlgmr.msra.gmra.mxu0 %v1433_v30 }
 0x252   :  { %v1349_v34 = vpop.f32.mrf.mxu0 }
 0x253   :  { %v1350_v35 = vadd.f32 %v1349_v34, %v584_v31  ;;  %v1390_v36 = vpop.f32.mrf.mxu1 }
 0x254   :  { %v1351_v37 = vpop.f32.mrf.mxu0 }
 0x255   :  { %v1391_v38 = vadd.f32 %v1390_v36, %v1350_v35  ;;  %v1352_v40 = vadd.f32 %v1351_v37, %v588_v33  ;;  %v1392_v41 = vpop.f32.mrf.mxu1 }
 0x256   :  { %v1353_v42 = vpop.f32.mrf.mxu0 }
 0x257   :  { %v1403_v43 = vand.u32 2147483647, %v1391_v38  ;;  %v1393_v45 = vadd.f32 %v1392_v41, %v1352_v40  ;;  %v1394_v46 = vpop.f32.mrf.mxu1  ;;  %v1399_v63 = vmax.f32 %v1391_v38, 0.0 }
 0x258   :  { %v1354_v52 = vpop.f32.mrf.mxu0 }
 0x259   :  { %v1407_v53 = vsub.f32 0.0, %v1403_v43  ;;  %v1404_v54 = vand.u32 2147483647, %v1393_v45  ;;  %v1395_v55 = vpop.f32.mrf.mxu1  ;;  %v1400_v0 = vmax.f32 %v1393_v45, 0.0 }
 0x25b   :  { %v1413_v56 = vmul.f32 1.442695, %v1407_v53  ;;  %v1408_v48 = vsub.f32 0.0, %v1404_v54 }
 0x25d   :  { %2561 = vpow2.f32 %v1413_v56  ;;  %v1415_v32 = vmul.f32 1.442695, %v1408_v48 }
 0x25f   :  { %2563 = vpow2.f32 %v1415_v32 }
 0x26a   :  { %v2562_v51 = vpop.eup %2561 }
 0x26b   :  { %v1419_v57 = vadd.f32 1.0, %v2562_v51 }
 0x26c   :  { %v2564_v58 = vpop.eup %2563 }
 0x26d   :  { %2565 = vlog2.f32 %v1419_v57  ;;  %v1420_v59 = vadd.f32 1.0, %v2564_v58 }
 0x26f   :  { %2567 = vlog2.f32 %v1420_v59 }
 0x27a   :  { %v2566_v60 = vpop.eup %2565 }
 0x27b   :  { %v1426_v61 = vmul.f32 0.6931472, %v2566_v60 }
 0x27c   :  { %v2568_v62 = vpop.eup %2567 }
 0x27d   :  { %v1428_v1 = vmul.f32 0.6931472, %v2568_v62  ;;  %v1431_v2 = vadd.f32 %v1426_v61, %v1399_v63 }
 0x27f   :  { %v1432_v44 = vadd.f32 %v1428_v1, %v1400_v0  ;;  %v1435_v3 = vpack.c.bf16 %v1431_v2, %v1431_v2 }
 0x281   :  { %v1436_v49 = vpack.c.bf16 %v1432_v44, %v1432_v44 }
 0x283   :  { %1906 = vmatprep.mubr.bf16.mxu1 %v1436_v49 }
 0x284   :  { %1907 = vmatmul.mubr.bf16.vlgmr.msra.gmra.mxu1 %v1435_v3 }
 0x304   :  { %v1867_v4 = vpop.f32.mrf.mxu0 }
 0x305   :  { %v1868_v11 = vadd.f32 %v1867_v4, %v1506_v9 }
 0x306   :  { %v1869_v5 = vpop.f32.mrf.mxu0 }
 0x307   :  { %v1870_v13 = vadd.f32 %v1869_v5, %v1510_v10 }
 0x308   :  { %v1871_v6 = vpop.f32.mrf.mxu0 }
 0x30a   :  { %v1872_v7 = vpop.f32.mrf.mxu0 }
 0x344   :  { %v1908_v12 = vpop.f32.mrf.mxu1 }
 0x345   :  { %v1909_v14 = vadd.f32 %v1908_v12, %v1868_v11 }
 0x346   :  { %v1910_v15 = vpop.f32.mrf.mxu1 }
 0x347   :  { %v1915_v16 = vmul.f32 0.5, %v1909_v14  ;;  %v1911_v17 = vadd.f32 %v1910_v15, %v1870_v13 }
 0x348   :  { %v1912_v18 = vpop.f32.mrf.mxu1 }
 0x349   :  { %2569 = vtanh.f32 %v1915_v16  ;;  %v1916_v19 = vmul.f32 0.5, %v1911_v17 }
 0x34a   :  { %v1913_v20 = vpop.f32.mrf.mxu1 }
 0x34b   :  { %2571 = vtanh.f32 %v1916_v19 }
 0x356   :  { %v2570_v21 = vpop.eup %2569 }
 0x357   :  { %v1919_v22 = vmul.f32 0.5, %v2570_v21 }
 0x358   :  { %v2572_v23 = vpop.eup %2571 }
 0x359   :  { %v1920_v24 = vmul.f32 0.5, %v2572_v23  ;;  %v1921_v25 = vadd.f32 0.5, %v1919_v22 }
 0x35b   :  { %v1922_v47 = vadd.f32 0.5, %v1920_v24 }
 0x35d   :  { %v2183_v26 = vpack.c.bf16 %v1922_v47, %v1921_v25 }
 0x35f   :  { %v1934_v50 = vrot.slane %v2183_v26, %v2775_v39  ;;  %2184 = vst.sshfl [vmem:[#allocation11] sm:$0x33 pattern:$0x76325410] %v2183_v26 }
 0x361   :  { %v1935_v27 = vcombine.high %v1934_v50, %v1934_v50 }
 0x363   :  { %1939 = vst [vmem:[#allocation11 + $0x4] sm:$0xf] %v1935_v27 }
 0x364   :  { %1944 = vsyncadd [#allocation4], 64  ;;  %s2714_s6 = smov [#allocation11]  }
 0x365   :  { %s1945_s8 = sshll.u32 %s2714_s6, 4  ;;  %s1946_s8 = int_to_ptr.vmem [resolvable:$true] %s1945_s8 }
 0x366   :  { %s2673_s9 = scalar_lea.vmem %s1946_s8, 64  ;;  %s2677_s10 = scalar_lea.vmem %s1946_s8, 128 }
 0x367   :  { %p2674_p11 = scmp.ne.s32.totalorder %s1946_s8, %s2673_s9  ;;  %p2678_p12 = scmp.lt.s32.totalorder %s1946_s8, %s1946_s8 }
 0x368   :  { %p2679_p13 = scmp.lt.s32.totalorder %s2677_s10, %s2673_s9 }
 0x36a   :  { %p2680_p0 = por %p2679_p13, %p2678_p12 }
 0x36c   :  { %p2681_p1 = pnand %p2680_p0, %p2674_p11 }
 0x36e   :  { %2684 = shalt.err (!%p2681_p1)
}
 0x36f   :  { %s2715_s11 = smov 64   ;;  %s2716_s12 = smov 4  }
 0x370   :  { %1951 = dma.vmem_to_hbm [thread:$0]  %s1946_s8, 64, %s2825_s7, [#allocation4], %s2715_s11, %s2715_s11, %s2716_s12  }
 0x371   :  { %2699 = dma.done.wait [#allocation4], 128  }
 0x372   :  { %2700 = vsyncadd [#allocation4], 4294967168 }
 0x373   :  { %1955 = vsyncpa [#allocation3], 1 }
 0x374   :  { %1956 = vsyncpa [#allocation6], 1 }
 0x375   :  { %1957 = vsyncpa [#allocation9], 1 }
 0x376   :  { %1958 = vsyncpa [#allocation4], 1 }

</bundles_post_ra>
